<compile_context>
chip_gen: v7x
topology: tpu7x:2x2x1
jax: 0.10.0
libtpu: 0.0.40
codegen_flags: <defaults>
</compile_context>

<pallas_src>
import functools

import jax
import jax.numpy as jnp
from jax import lax
from jax.experimental import pallas as pl
from jax.experimental.pallas import tpu as pltpu

# loss coefficients (LinearBatchLoss / LinearModelRegularization components)
COEF_CE = 1.0
COEF_CLUSTER = 0.8
COEF_SEPARATION = -0.08
COEF_L1 = 1e-4

_NEG_BIG = -1e30  # padding value for logits (finite: avoids -inf - -inf NaNs)


def _round_up(x, m):
    return (x + m - 1) // m * m


def _batch_loss_kernel(target_ref, logits_ref, sim_ref, proto_cls_ref,
                       out_ref, acc_ref, *, batch_size, tile_b):
    """One batch tile per grid step; accumulates the weighted per-row sums."""
    step = pl.program_id(0)
    nsteps = pl.num_programs(0)

    @pl.when(step == 0)
    def _init():
        acc_ref[...] = jnp.zeros_like(acc_ref)

    target = target_ref[...]                               # (TB, 1)  int32
    proto_cls = proto_cls_ref[...]                         # (1, Pp)  int32
    sim = sim_ref[...].astype(jnp.float32)                 # (TB, Pp)
    logits = logits_ref[...].astype(jnp.float32)           # (TB, Cp)

    tb, cp = logits.shape

    # Rows beyond the real batch are padding -> exclude from the sums.
    row_idx = lax.broadcasted_iota(jnp.int32, (tb, 1), 0) + step * tile_b
    row_mask = (row_idx < batch_size).astype(jnp.float32)  # (TB, 1)

    # prototypes_of_correct_class via VPU broadcast compare (no MXU matmul).
    # Padded prototype slots carry class id -1 and never match a target.
    correct = (proto_cls == target).astype(jnp.float32)    # (TB, Pp)

    # cluster / separation.  sim*wrong == sim - sim*correct (one product).
    # Note: max over (sim * mask) keeps the reference's zero-for-masked
    # semantics (valid for non-negative ProtoPNet similarities); padded
    # similarity columns are 0 and therefore never change the max.
    sim_correct = sim * correct
    correct_act = jnp.max(sim_correct, axis=1, keepdims=True)          # (TB,1)
    incorrect_act = jnp.max(sim - sim_correct, axis=1, keepdims=True)  # (TB,1)

    # cross entropy; padded logit columns are -1e30 -> exp underflows to 0.
    m = jnp.max(logits, axis=1, keepdims=True)                         # (TB,1)
    lse = m + jnp.log(jnp.sum(jnp.exp(logits - m), axis=1, keepdims=True))
    class_iota = lax.broadcasted_iota(jnp.int32, (1, cp), 1)
    onehot = (class_iota == target).astype(jnp.float32)                # (TB,Cp)
    tgt_logit = jnp.sum(logits * onehot, axis=1, keepdims=True)        # (TB,1)
    ce = lse - tgt_logit                                               # (TB,1)

    weighted = row_mask * (COEF_CE * ce
                           - COEF_CLUSTER * correct_act
                           + COEF_SEPARATION * incorrect_act)
    acc_ref[...] += jnp.sum(weighted, keepdims=True)                   # (1,1)

    @pl.when(step == nsteps - 1)
    def _finalize():
        out_ref[...] = acc_ref[...] * (1.0 / batch_size)


def protopnet_batch_loss(target, logits, similarity, prototype_class_id,
                         *, tile_b=512):
    """target: (B,) int; logits: (B,C); similarity: (B,P);
    prototype_class_id: (P,) int32 class id of each prototype."""
    B, C = logits.shape
    P = similarity.shape[1]

    TB = min(_round_up(B, 8), tile_b)
    B_pad = _round_up(B, TB)
    C_pad = _round_up(C, 128)
    P_pad = _round_up(P, 128)
    n_steps = B_pad // TB

    # Lane-dense padding (done once in the wrapper, masked in-kernel).
    logits_p = jnp.full((B_pad, C_pad), _NEG_BIG, dtype=logits.dtype)
    logits_p = logits_p.at[:B, :C].set(logits)
    sim_p = jnp.zeros((B_pad, P_pad), dtype=similarity.dtype)
    sim_p = sim_p.at[:B, :P].set(similarity)
    target_p = jnp.zeros((B_pad, 1), dtype=jnp.int32)
    target_p = target_p.at[:B, 0].set(target.astype(jnp.int32))
    proto_cls_p = jnp.full((1, P_pad), -1, dtype=jnp.int32)
    proto_cls_p = proto_cls_p.at[0, :P].set(prototype_class_id.astype(jnp.int32))

    kernel = functools.partial(_batch_loss_kernel, batch_size=B, tile_b=TB)

    bytes_accessed = (logits_p.size * logits_p.dtype.itemsize
                      + sim_p.size * sim_p.dtype.itemsize
                      + target_p.size * 4 + proto_cls_p.size * 4 + 4)
    cost = pl.CostEstimate(
        flops=int(6 * B_pad * C_pad + 5 * B_pad * P_pad),
        transcendentals=int(B_pad * C_pad + B_pad),
        bytes_accessed=int(bytes_accessed))

    out = pl.pallas_call(
        kernel,
        out_shape=jax.ShapeDtypeStruct((1, 1), jnp.float32),
        grid=(n_steps,),
        in_specs=[
            pl.BlockSpec((TB, 1), lambda i: (i, 0)),       # target
            pl.BlockSpec((TB, C_pad), lambda i: (i, 0)),   # logits
            pl.BlockSpec((TB, P_pad), lambda i: (i, 0)),   # similarity
            pl.BlockSpec((1, P_pad), lambda i: (0, 0)),    # prototype class id
        ],
        out_specs=pl.BlockSpec((1, 1), lambda i: (0, 0)),
        scratch_shapes=[pltpu.VMEM((1, 1), jnp.float32)],
        compiler_params=pltpu.CompilerParams(
            dimension_semantics=("arbitrary",)),
        cost_estimate=cost,
    )(target_p, logits_p, sim_p, proto_cls_p)
    return out[0, 0]


def protopnet_l1_regularization(last_layer_weight, prototype_class_id):
    """Batch-independent model regularization, hoisted out of the per-batch
    kernel (compute once per optimizer step in plain XLA)."""
    C = last_layer_weight.shape[0]
    wrong = (prototype_class_id[None, :].astype(jnp.int32)
             != jnp.arange(C, dtype=jnp.int32)[:, None])
    return jnp.sum(jnp.abs(last_layer_weight) * wrong.astype(last_layer_weight.dtype))


def protopnet_loss(target, logits, similarity, prototype_class_identity_pc,
                   last_layer_weight):
    """target: (B,); logits: (B,C); similarity: (B,P);
    prototype_class_identity_pc: (P,C) one-hot as in PyTorch ProtoPNet;
    last_layer_weight: (C,P) = nn.Linear(P, C).weight."""
    proto_class_id = jnp.argmax(prototype_class_identity_pc, axis=1).astype(jnp.int32)
    batch = protopnet_batch_loss(target, logits, similarity, proto_class_id)
    l1 = protopnet_l1_regularization(last_layer_weight.astype(jnp.float32),
                                     proto_class_id)
    return batch + COEF_L1 * l1


def protopnet_loss_ref(target, logits, similarity, proto_id_pc, llw):
    """Pure-JAX reference reproducing the PyTorch semantics."""
    B = target.shape[0]
    C = logits.shape[1]
    onehot = jax.nn.one_hot(target, C, dtype=jnp.float32)
    correct = onehot @ proto_id_pc.T.astype(jnp.float32)   # (B, P)
    wrong = 1.0 - correct
    lse = jax.scipy.special.logsumexp(logits, axis=1)
    ce = jnp.mean(lse - logits[jnp.arange(B), target])
    cluster = -jnp.mean(jnp.max(similarity * correct, axis=1))
    separation = jnp.mean(jnp.max(similarity * wrong, axis=1))
    l1 = jnp.sum(jnp.abs(llw * (1.0 - proto_id_pc.T)))
    return (COEF_CE * ce + COEF_CLUSTER * cluster
            + COEF_SEPARATION * separation + COEF_L1 * l1)


if __name__ == "__main__":
    def run_case(B, C, P, key):
        k1, k2, k3, k4 = jax.random.split(key, 4)
        target = jax.random.randint(k1, (B,), 0, C, dtype=jnp.int32)
        logits = jax.random.normal(k2, (B, C), dtype=jnp.float32)
        similarity = jax.random.uniform(k3, (B, P), dtype=jnp.float32)
        # prototype_class_identity: (P, C) one-hot, prototype j -> class j % C
        proto_id_pc = jax.nn.one_hot(jnp.arange(P) % C, C, dtype=jnp.float32)
        # last layer nn.Linear(P, C).weight -> (C, P)
        llw = jax.random.normal(k4, (C, P), dtype=jnp.float32) * 0.1

        out = protopnet_loss(target, logits, similarity, proto_id_pc, llw)
        out = jax.block_until_ready(out)
        ref = protopnet_loss_ref(target, logits, similarity, proto_id_pc, llw)
        assert jnp.allclose(out, ref, rtol=1e-5, atol=1e-5), (B, C, P, out, ref)

    run_case(8, 4, 16, jax.random.PRNGKey(0))     # original toy shape
    run_case(13, 6, 40, jax.random.PRNGKey(1))    # exercises B/C/P padding + row masking
    print("KERNEL_OK")
</pallas_src>

<mosaic_0001>
module attributes {stable_mosaic.version = 11 : i64} {
  func.func @_batch_loss_kernel(%arg0: i32, %arg1: memref<8x1xi32, #tpu.memory_space<vmem>>, %arg2: memref<8x128xf32, #tpu.memory_space<vmem>>, %arg3: memref<8x128xf32, #tpu.memory_space<vmem>>, %arg4: memref<1x128xi32, #tpu.memory_space<vmem>>, %arg5: memref<1x1xf32, #tpu.memory_space<vmem>>, %arg6: memref<1x1xf32, #tpu.memory_space<vmem>>) attributes {dimension_semantics = [#tpu.dimension_semantics<arbitrary>], iteration_bounds = array<i64: 1>, scalar_prefetch = 0 : i64, scratch_operands = 1 : i64, tpu.core_type = #tpu.core_type<tc>, window_params = [{transform_indices = @transform_0, window_bounds = array<i64: 8, 1>}, {transform_indices = @transform_1, window_bounds = array<i64: 8, 128>}, {transform_indices = @transform_2, window_bounds = array<i64: 8, 128>}, {pipeline_mode = #tpu.pipeline_mode<synchronous>, transform_indices = @transform_3, window_bounds = array<i64: 1, 128>}, {pipeline_mode = #tpu.pipeline_mode<synchronous>, transform_indices = @transform_4, window_bounds = array<i64: 1, 1>}]} {
    %c0_i32 = arith.constant 0 : i32
    %0 = arith.cmpi eq, %arg0, %c0_i32 : i32
    %1 = arith.extui %0 : i1 to i32
    %c0_i32_0 = arith.constant 0 : i32
    %2 = arith.cmpi ne, %1, %c0_i32_0 : i32
    scf.if %2 {
      %cst_23 = arith.constant 0.000000e+00 : f32
      %65 = vector.broadcast %cst_23 : f32 to vector<1x1xf32>
      %c0_24 = arith.constant 0 : index
      %c0_25 = arith.constant 0 : index
      %66 = vector.load %arg6[%c0_24, %c0_25] : memref<1x1xf32, #tpu.memory_space<vmem>>, vector<1x1xf32>
      tpu.vector_store %arg6[%c0_24, %c0_25], %65 {strides = array<i32>} : memref<1x1xf32, #tpu.memory_space<vmem>>, vector<1x1xf32>,
    } else {
    }
    %c0 = arith.constant 0 : index
    %c0_1 = arith.constant 0 : index
    %3 = vector.load %arg1[%c0, %c0_1] : memref<8x1xi32, #tpu.memory_space<vmem>>, vector<8x1xi32>
    %c0_2 = arith.constant 0 : index
    %c0_3 = arith.constant 0 : index
    %4 = vector.load %arg4[%c0_2, %c0_3] : memref<1x128xi32, #tpu.memory_space<vmem>>, vector<1x128xi32>
    %c0_4 = arith.constant 0 : index
    %c0_5 = arith.constant 0 : index
    %5 = vector.load %arg3[%c0_4, %c0_5] : memref<8x128xf32, #tpu.memory_space<vmem>>, vector<8x128xf32>
    %c0_6 = arith.constant 0 : index
    %c0_7 = arith.constant 0 : index
    %6 = vector.load %arg2[%c0_6, %c0_7] : memref<8x128xf32, #tpu.memory_space<vmem>>, vector<8x128xf32>
    %7 = tpu.iota {dimensions = array<i32: 0>} : vector<8x1xi32>
    %c8_i32 = arith.constant 8 : i32
    %8 = arith.muli %arg0, %c8_i32 : i32
    %9 = vector.broadcast %8 : i32 to vector<8x1xi32>
    %10 = arith.addi %7, %9 : vector<8x1xi32>
    %c8_i32_8 = arith.constant 8 : i32
    %11 = vector.broadcast %c8_i32_8 : i32 to vector<8x1xi32>
    %12 = arith.cmpi slt, %10, %11 : vector<8x1xi32>
    %13 = arith.extui %12 : vector<8x1xi1> to vector<8x1xi32>
    %14 = arith.sitofp %13 : vector<8x1xi32> to vector<8x1xf32>
    %15 = vector.broadcast %4 : vector<1x128xi32> to vector<8x128xi32>
    %16 = vector.broadcast %3 : vector<8x1xi32> to vector<8x128xi32>
    %17 = arith.cmpi eq, %15, %16 : vector<8x128xi32>
    %18 = arith.extui %17 : vector<8x128xi1> to vector<8x128xi32>
    %19 = arith.sitofp %18 : vector<8x128xi32> to vector<8x128xf32>
    %20 = arith.mulf %5, %19 : vector<8x128xf32>
    %cst = arith.constant dense<0xFF800000> : vector<8xf32>
    %21 = vector.multi_reduction <maximumf>, %20, %cst [1] : vector<8x128xf32> to vector<8xf32>
    %22 = vector.shape_cast %21 : vector<8xf32> to vector<8x1xf32>
    %23 = arith.subf %5, %20 : vector<8x128xf32>
    %cst_9 = arith.constant dense<0xFF800000> : vector<8xf32>
    %24 = vector.multi_reduction <maximumf>, %23, %cst_9 [1] : vector<8x128xf32> to vector<8xf32>
    %25 = vector.shape_cast %24 : vector<8xf32> to vector<8x1xf32>
    %cst_10 = arith.constant dense<0xFF800000> : vector<8xf32>
    %26 = vector.multi_reduction <maximumf>, %6, %cst_10 [1] : vector<8x128xf32> to vector<8xf32>
    %27 = vector.shape_cast %26 : vector<8xf32> to vector<8x1xf32>
    %28 = vector.broadcast %27 : vector<8x1xf32> to vector<8x128xf32>
    %29 = arith.subf %6, %28 : vector<8x128xf32>
    %30 = math.exp %29 : vector<8x128xf32>
    %cst_11 = arith.constant dense<0.000000e+00> : vector<8xf32>
    %31 = vector.multi_reduction <add>, %30, %cst_11 [1] : vector<8x128xf32> to vector<8xf32>
    %32 = vector.shape_cast %31 : vector<8xf32> to vector<8x1xf32>
    %33 = math.log %32 : vector<8x1xf32>
    %34 = arith.addf %27, %33 : vector<8x1xf32>
    %35 = tpu.iota {dimensions = array<i32: 1>} : vector<1x128xi32>
    %36 = vector.broadcast %35 : vector<1x128xi32> to vector<8x128xi32>
    %37 = vector.broadcast %3 : vector<8x1xi32> to vector<8x128xi32>
    %38 = arith.cmpi eq, %36, %37 : vector<8x128xi32>
    %39 = arith.extui %38 : vector<8x128xi1> to vector<8x128xi32>
    %40 = arith.sitofp %39 : vector<8x128xi32> to vector<8x128xf32>
    %41 = arith.mulf %6, %40 : vector<8x128xf32>
    %cst_12 = arith.constant dense<0.000000e+00> : vector<8xf32>
    %42 = vector.multi_reduction <add>, %41, %cst_12 [1] : vector<8x128xf32> to vector<8xf32>
    %43 = vector.shape_cast %42 : vector<8xf32> to vector<8x1xf32>
    %44 = arith.subf %34, %43 : vector<8x1xf32>
    %cst_13 = arith.constant 1.000000e+00 : f32
    %45 = vector.broadcast %cst_13 : f32 to vector<8x1xf32>
    %46 = arith.mulf %45, %44 : vector<8x1xf32>
    %cst_14 = arith.constant 8.000000e-01 : f32
    %47 = vector.broadcast %cst_14 : f32 to vector<8x1xf32>
    %48 = arith.mulf %47, %22 : vector<8x1xf32>
    %49 = arith.subf %46, %48 : vector<8x1xf32>
    %cst_15 = arith.constant -8.000000e-02 : f32
    %50 = vector.broadcast %cst_15 : f32 to vector<8x1xf32>
    %51 = arith.mulf %50, %25 : vector<8x1xf32>
    %52 = arith.addf %49, %51 : vector<8x1xf32>
    %53 = arith.mulf %14, %52 : vector<8x1xf32>
    %c0_16 = arith.constant 0 : index
    %c0_17 = arith.constant 0 : index
    %54 = vector.load %arg6[%c0_16, %c0_17] : memref<1x1xf32, #tpu.memory_space<vmem>>, vector<1x1xf32>
    %55 = vector.shape_cast %53 : vector<8x1xf32> to vector<1x8x1xf32>
    %cst_18 = arith.constant dense<0.000000e+00> : vector<1xf32>
    %56 = vector.multi_reduction <add>, %55, %cst_18 [1, 2] : vector<1x8x1xf32> to vector<1xf32>
    %57 = vector.shape_cast %56 : vector<1xf32> to vector<1x1x1xf32>
    %58 = vector.extract %57[0, 0, 0] : f32 from vector<1x1x1xf32>
    %59 = vector.broadcast %58 : f32 to vector<1x1xf32>
    %60 = arith.addf %54, %59 : vector<1x1xf32>
    %c0_19 = arith.constant 0 : index
    %c0_20 = arith.constant 0 : index
    %61 = vector.load %arg6[%c0_19, %c0_20] : memref<1x1xf32, #tpu.memory_space<vmem>>, vector<1x1xf32>
    tpu.vector_store %arg6[%c0_19, %c0_20], %60 {strides = array<i32>} : memref<1x1xf32, #tpu.memory_space<vmem>>, vector<1x1xf32>,
    %c0_i32_21 = arith.constant 0 : i32
    %62 = arith.cmpi eq, %arg0, %c0_i32_21 : i32
    %63 = arith.extui %62 : i1 to i32
    %c0_i32_22 = arith.constant 0 : i32
    %64 = arith.cmpi ne, %63, %c0_i32_22 : i32
    scf.if %64 {
      %c0_23 = arith.constant 0 : index
      %c0_24 = arith.constant 0 : index
      %65 = vector.load %arg6[%c0_23, %c0_24] : memref<1x1xf32, #tpu.memory_space<vmem>>, vector<1x1xf32>
      %cst_25 = arith.constant 1.250000e-01 : f32
      %66 = vector.broadcast %cst_25 : f32 to vector<1x1xf32>
      %67 = arith.mulf %65, %66 : vector<1x1xf32>
      %c0_26 = arith.constant 0 : index
      %c0_27 = arith.constant 0 : index
      %68 = vector.load %arg5[%c0_26, %c0_27] : memref<1x1xf32, #tpu.memory_space<vmem>>, vector<1x1xf32>
      tpu.vector_store %arg5[%c0_26, %c0_27], %67 {strides = array<i32>} : memref<1x1xf32, #tpu.memory_space<vmem>>, vector<1x1xf32>,
    } else {
    }
    return
  }
  func.func @transform_0(%arg0: i32) -> (i32, i32) {
    %c0_i32 = arith.constant 0 : i32
    %c0_i32_0 = arith.constant 0 : i32
    return %arg0, %c0_i32 : i32, i32
  }
  func.func @transform_1(%arg0: i32) -> (i32, i32) {
    %c0_i32 = arith.constant 0 : i32
    %c0_i32_0 = arith.constant 0 : i32
    return %arg0, %c0_i32 : i32, i32
  }
  func.func @transform_2(%arg0: i32) -> (i32, i32) {
    %c0_i32 = arith.constant 0 : i32
    %c0_i32_0 = arith.constant 0 : i32
    return %arg0, %c0_i32 : i32, i32
  }
  func.func @transform_3(%arg0: i32) -> (i32, i32) {
    %c0_i32 = arith.constant 0 : i32
    %c0_i32_0 = arith.constant 0 : i32
    %c0_i32_1 = arith.constant 0 : i32
    return %c0_i32, %c0_i32_0 : i32, i32
  }
  func.func @transform_4(%arg0: i32) -> (i32, i32) {
    %c0_i32 = arith.constant 0 : i32
    %c0_i32_0 = arith.constant 0 : i32
    %c0_i32_1 = arith.constant 0 : i32
    return %c0_i32, %c0_i32_0 : i32, i32
  }
}

</mosaic_0001>

<bundles_post_ra>
// kernel: tpu_custom_call.1
= control target key start
LH: loop header
LB: loop body
LE: loop exit
PB: predicated region body
PF: predicated region fallthrough
CT: control target
= control target key end

     0   :  { %s204_s0 = inlined_call_operand.vmem [shape: s32[8,1], index: 0, kind: input, shape index: {}]   ;;  %s205_s1 = inlined_call_operand.vmem [shape: f32[8,128], index: 1, kind: input, shape index: {}]   ;;  %s206_s2 = inlined_call_operand.vmem [shape: f32[8,128], index: 2, kind: input, shape index: {}]   ;;  %s207_s3 = inlined_call_operand.vmem [shape: s32[1,128], index: 3, kind: input, shape index: {}]   ;;  %s208_s4 = inlined_call_operand.hbm [shape: f32[1,1], index: 4, kind: output, shape index: {}]  }
   0x1   :  { %v27_v0 = vld [vmem:[%s205_s1] sm:$0xff] }
   0x2   :  { %9 = vsyncpa [#allocation4], 0  ;;  %52 = vmax.xlane.f32.xlu0 %v27_v0  ;;  %v149_v1 = vmov 0   ;;  %v24_v2 = vld [vmem:[%s204_s0] sm:$0xff]  ;;  %v62_v6 = vlaneseq  ;;  %v150_v10 = vmov 0.0   ;;  %vm77_vm2 = vcmask 7168  }
   0x3   :  { %120 = vset.pattern.permute.xlu0 %v149_v1  ;;  %v112_v7 = vld [vmem:[%s207_s3] ss:$0 sm:$0xff]  ;;  %vm22_vm3 = vcmask 0  }
   0x4   :  { %v63_v9 = vand.u32 127, %v62_v6  ;;  %v26_v12 = vld [vmem:[%s206_s2] sm:$0xff]  ;;  %23 = vst.msk [vmem:[#allocation2] sm:$0x1] %vm22_vm3, %v150_v10  ;;  %s151_s2 = smov [#allocation3]  }
   0x5   :  { %s104_s3 = sshll.u32 %s151_s2, 4  ;;  %s105_s3 = int_to_ptr.vmem [resolvable:$true] %s104_s3 }
   0x6   :  { %s125_s22 = scalar_lea.vmem %s105_s3, 16  ;;  %s129_s23 = scalar_lea.vmem %s105_s3, 32 }
   0x7   :  { %p126_p0 = scmp.ne.s32.totalorder %s105_s3, %s125_s22  ;;  %p130_p1 = scmp.lt.s32.totalorder %s105_s3, %s105_s3 }
   0x8   :  { %p131_p2 = scmp.lt.s32.totalorder %s129_s23, %s125_s22 }
   0xa   :  { %p132_p3 = por %p131_p2, %p130_p1 }
   0xb   :  { %v76_v38 = vld [vmem:[#allocation2] sm:$0x1] }
   0xc   :  { %p133_p4 = pnand %p132_p3, %p126_p0 }
  0x18   :  { %41 = vperm.xlu0 %120, %v24_v2  }
  0x8f   :  { %v53_v3 = vpop.xlane.xlu0 %52 }
  0x90   :  { %v54_v4 = vsub.f32 %v27_v0, %v53_v3 }
  0x92   :  { %v55_v5 = vmul.f32 1.442695, %v54_v4 }
  0x94   :  { %121 = vpow2.f32 %v55_v5 }
  0x97   :  { %v42_v8 = vpop.permute.xlu0 %41 }
  0x98   :  { %vm43_vm0 = vcmp.eq.s32.totalorder %v112_v7, %v42_v8  ;;  %vm64_vm1 = vcmp.eq.s32.totalorder %v63_v9, %v42_v8 }
  0x99   :  { %v113_v11 = vsel %vm43_vm0, 1.0, %v150_v10  ;;  %v114_v15 = vsel %vm64_vm1, 1.0, %v150_v10 }
  0x9a   :  { %v46_v14 = vmul.f32 %v113_v11, %v26_v12  ;;  %v67_v16 = vmul.f32 %v114_v15, %v27_v0 }
  0x9c   :  { %v49_v17 = vsub.f32 %v26_v12, %v46_v14 }
  0x9e   :  { %v122_v13 = vpop.eup %121 }
  0x9f   :  { %57 = vadd.xlane.f32.xlu1 %v122_v13 }
  0xa3   :  { %47 = vmax.xlane.f32.xlu1 %v46_v14 }
  0xa7   :  { %68 = vadd.xlane.f32.xlu1 %v67_v16 }
  0xab   :  { %50 = vmax.xlane.f32.xlu1 %v49_v17 }
 0x12c   :  { %v58_v18 = vpop.xlane.xlu1 %57 }
 0x12d   :  { %123 = vlog2.f32 %v58_v18 }
 0x130   :  { %v48_v19 = vpop.xlane.xlu1 %47 }
 0x131   :  { %v71_v25 = vmul.f32 0.8, %v48_v19 }
 0x134   :  { %v69_v20 = vpop.xlane.xlu1 %68 }
 0x137   :  { %v124_v21 = vpop.eup %123 }
 0x138   :  { %v60_v22 = vmul.f32 0.6931472, %v124_v21  ;;  %v51_v24 = vpop.xlane.xlu1 %50 }
 0x139   :  { %v73_v28 = vmul.f32 -0.08, %v51_v24 }
 0x13a   :  { %v61_v23 = vadd.f32 %v60_v22, %v53_v3 }
 0x13c   :  { %v70_v26 = vsub.f32 %v61_v23, %v69_v20 }
 0x13e   :  { %v72_v27 = vsub.f32 %v70_v26, %v71_v25 }
 0x140   :  { %v74_v29 = vadd.f32 %v73_v28, %v72_v27 }
 0x142   :  { %v78_v30 = vsel %vm77_vm2, %v74_v29, 0.0 }
 0x143   :  { %79 = vadd.xlane.f32.xlu1 %v78_v30 }
 0x1d0   :  { %v80_v31 = vpop.xlane.xlu1 %79 }
 0x1d1   :  { %v81_v32 = vrot.slane %v80_v31, 4 }
 0x1d3   :  { %v82_v33 = vadd.f32 %v81_v32, %v80_v31 }
 0x1d5   :  { %v83_v34 = vrot.slane %v82_v33, 2 }
 0x1d7   :  { %v84_v35 = vadd.f32 %v83_v34, %v82_v33 }
 0x1d9   :  { %v85_v36 = vrot.slane %v84_v35, 1 }
 0x1db   :  { %v86_v37 = vadd.f32 %v85_v36, %v84_v35 }
 0x1dd   :  { %115 = vpush %v86_v37 }
 0x20e   :  { %s116_s0 = spop %115 }
 0x20f   :  { %v88_v39 = vstv %s116_s0 }
 0x210   :  { %v89_v40 = vadd.f32 %v88_v39, %v76_v38 }
 0x212   :  { %91 = vst.msk [vmem:[#allocation2] sm:$0x1] %vm22_vm3, %v89_v40 }
 0x219   :  { %v95_v41 = vld [vmem:[#allocation2] sm:$0x1] }
 0x21a   :  { %v96_v42 = vmul.f32 0.125, %v95_v41 }
 0x21c   :  { %97 = vst.msk [vmem:[#allocation3] sm:$0x1] %vm22_vm3, %v96_v42 }
 0x21d   :  { %136 = shalt.err (!%p133_p4)
}
 0x21e   :  { %s137_s26 = scalar_lea.hbm %s208_s4, 16 }
 0x21f   :  { %p138_p5 = scmp.ne.s32.totalorder %s208_s4, %s137_s26  ;;  %p141_p6 = scmp.lt.u32.totalorder %s137_s26, %s208_s4 }
 0x221   :  { %p143_p7 = pnand %p141_p6, %p138_p5 }
 0x223   :  { %146 = shalt.err (!%p143_p7)
}
 0x224   :  { %107 = dma.vmem_to_hbm [thread:$0]  %s105_s3, 16, %s208_s4, [#allocation4]  }
 0x225   :  { %147 = dma.done.wait [#allocation4], 16  }
 0x226   :  { %148 = vsyncadd [#allocation4], 4294967280 }
 0x227   :  { %111 = vsyncpa [#allocation4], 1 }

</bundles_post_ra>
